<compile_context>
chip_gen: v7x
topology: tpu7x:2x2x1
jax: 0.10.0
libtpu: 0.0.40
codegen_flags: <defaults>
</compile_context>

<pallas_src>
import functools

import jax
import jax.numpy as jnp
from jax.experimental import pallas as pl
from jax.experimental.pallas import tpu as pltpu  # noqa: F401

HIDDEN = 32    # hidden_channels (out_channels of HANConv)
HEADS = 8      # attention heads
NEG_SLOPE = 0.2
LANE = 128


# --------------------------------------------------------------------------
# Kernel A: fused per-node-type projection + node-level attention logits.
# --------------------------------------------------------------------------
def _make_proj_alpha_kernel(natt_list):
    n_in = sum(3 + (1 if n else 0) for n in natt_list)

    def kernel(*refs):
        in_refs, out_refs = refs[:n_in], refs[n_in:]
        i = o = 0
        for n_att in natt_list:
            x_ref, w_ref, b_ref = in_refs[i], in_refs[i + 1], in_refs[i + 2]
            i += 3
            xp = jnp.dot(x_ref[...], w_ref[...],
                         preferred_element_type=jnp.float32) + b_ref[...]
            out_refs[o][...] = xp                              # [N, C] projection
            o += 1
            if n_att:
                # alpha = (x_proj.view(N,H,D) * att).sum(-1) folded into one
                # matmul against the pre-scaled pooling matrix P [C, n_att*H];
                # x_proj is still resident in VMEM (no extra HBM round-trip).
                p_ref = in_refs[i]
                i += 1
                out_refs[o][...] = jnp.dot(xp, p_ref[...],
                                           preferred_element_type=jnp.float32)
                o += 1
    return kernel


# --------------------------------------------------------------------------
# Kernel B: fused per-edge-type aggregation + semantic attention + classifier.
# All arrays are kept transposed ([C, N] / [C, E]) so the only stored output
# is a lane-dense [1, E_pad] row and no in-kernel transposes are required.
# --------------------------------------------------------------------------
def _make_fused_agg_classifier_kernel(et_dst_types, node_types, cls_src, cls_dst,
                                      with_semantic):
    num_et = len(et_dst_types)

    def kernel(*refs):
        base = 2 * num_et
        if with_semantic:
            wkT_ref, bkT_ref, qT_ref = refs[base], refs[base + 1], refs[base + 2]
            base += 3
        gsT_ref, gdT_ref, o_ref = refs[base], refs[base + 1], refs[base + 2]

        # node-level aggregation: out_et^T = relu(msg^T @ scatter^T)  -> [C, Nd]
        # (all heads at once; equivalent to relu(scatter @ msg) transposed)
        outs = {nt: [] for nt in node_types}
        for t in range(num_et):
            mT_ref, pT_ref = refs[2 * t], refs[2 * t + 1]
            zT = jax.nn.relu(jnp.dot(mT_ref[...], pT_ref[...],
                                     preferred_element_type=jnp.float32))
            outs[et_dst_types[t]].append(zT)

        def semantic(xsT):
            # HANConv group(): softmax over edge types of
            #   (q * tanh(k_lin(out)).mean(nodes)).sum(channels)
            # With a single edge type the softmax weight is exactly 1.0 -> skip.
            if len(xsT) == 1:
                return xsT[0]
            scores = []
            for xT in xsT:
                kxT = jnp.tanh(jnp.dot(wkT_ref[...], xT,
                                       preferred_element_type=jnp.float32)
                               + bkT_ref[...])
                s = jnp.sum(qT_ref[...] * jnp.mean(kxT, axis=1, keepdims=True),
                            axis=0, keepdims=True)             # [1, 1]
                scores.append(s)
            m = scores[0]
            for s in scores[1:]:
                m = jnp.maximum(m, s)
            exps = [jnp.exp(s - m) for s in scores]
            denom = exps[0]
            for e in exps[1:]:
                denom = denom + e
            zT = (exps[0] / denom) * xsT[0]
            for e, xT in zip(exps[1:], xsT[1:]):
                zT = zT + (e / denom) * xT
            return zT

        # Only the two classifier node types are needed by Model.forward.
        z_srcT = semantic(outs[cls_src])        # [C, N_src]
        z_dstT = semantic(outs[cls_dst])        # [C, N_dst]

        # classifier: gather rows via one-hot matmuls, then per-edge dot product.
        fsT = jnp.dot(z_srcT, gsT_ref[...], preferred_element_type=jnp.float32)
        fdT = jnp.dot(z_dstT, gdT_ref[...], preferred_element_type=jnp.float32)
        o_ref[...] = jnp.sum(fsT * fdT, axis=0, keepdims=True)   # [1, E_pad]
    return kernel


# --------------------------------------------------------------------------
# JAX glue (ragged segment softmax; stays in XLA by design)
# --------------------------------------------------------------------------
def segment_softmax(logits, segment_ids, num_segments):
    # softmax over edges grouped by destination node.  Destinations with no
    # incoming edges never get referenced -> downstream rows end up all-zero
    # (matches eval-mode HANConv); no 0/0 NaN is produced.
    seg_max = jax.ops.segment_max(logits, segment_ids, num_segments=num_segments)
    seg_max = jnp.where(jnp.isfinite(seg_max), seg_max, 0.0)
    ex = jnp.exp(logits - seg_max[segment_ids])
    seg_sum = jax.ops.segment_sum(ex, segment_ids, num_segments=num_segments)
    return ex / seg_sum[segment_ids]


# --------------------------------------------------------------------------
# Full forward pass
# --------------------------------------------------------------------------
def han_link_prediction_forward(params, x_dict, edge_index_dict, edge_label_index,
                                metadata, cls_src='paper', cls_dst='copaper'):
    node_types, edge_types = metadata
    C, H = HIDDEN, HEADS
    D = C // H

    # which attention vectors each node type needs (src/dst role per edge type)
    att_specs = {nt: [] for nt in node_types}
    for et in edge_types:
        key = '__'.join(et)
        s, _, d = et
        att_specs[s].append((key, 'src'))
        att_specs[d].append((key, 'dst'))

    # per-head pooling matrix pool[c, h] = 1 iff c // D == h (built once, in XLA)
    c_idx = jnp.arange(C)[:, None]
    h_idx = jnp.arange(H)[None, :]
    pool = ((c_idx // D) == h_idx).astype(jnp.float32)          # [C, H]

    # ---------------- Kernel A: fused projection + alpha (one launch) ----
    natt_list, inputs, out_shapes = [], [], []
    for nt in node_types:
        p = params['proj'][nt]
        att_mats = []
        for key, role in att_specs[nt]:
            vec = (params['att_src'][key] if role == 'src'
                   else params['att_dst'][key]).reshape(C)
            att_mats.append(vec[:, None] * pool)                 # [C, H]
        n_att = len(att_mats)
        natt_list.append(n_att)
        inputs.extend([x_dict[nt], p['w'], p['b'].reshape(1, C)])
        out_shapes.append(jax.ShapeDtypeStruct((x_dict[nt].shape[0], C), jnp.float32))
        if n_att:
            inputs.append(jnp.concatenate(att_mats, axis=1))     # [C, n_att*H]
            out_shapes.append(
                jax.ShapeDtypeStruct((x_dict[nt].shape[0], n_att * H), jnp.float32))

    results = pl.pallas_call(
        _make_proj_alpha_kernel(tuple(natt_list)),
        out_shape=tuple(out_shapes),
    )(*inputs)

    x_proj, alphas, ri = {}, {}, 0
    for nt, n_att in zip(node_types, natt_list):
        x_proj[nt] = results[ri]; ri += 1
        if n_att:
            alphas[nt] = results[ri]; ri += 1

    att_col = {}
    for nt in node_types:
        for idx, (key, role) in enumerate(att_specs[nt]):
            att_col[(key, role)] = (nt, idx)

    # ------------ per-edge-type ragged softmax + message build (glue) ----
    mt_pt_inputs, et_dst_types = [], []
    for et in edge_types:
        s, _, d = et
        key = '__'.join(et)
        src_idx, dst_idx = edge_index_dict[et][0], edge_index_dict[et][1]
        Nd = x_dict[d].shape[0]
        E = src_idx.shape[0]

        nt_s, a_s = att_col[(key, 'src')]
        nt_d, a_d = att_col[(key, 'dst')]
        a_src = alphas[nt_s][:, a_s * H:(a_s + 1) * H]
        a_dst = alphas[nt_d][:, a_d * H:(a_d + 1) * H]

        logit = a_src[src_idx] + a_dst[dst_idx]                    # [E, H]
        logit = jnp.where(logit >= 0, logit, NEG_SLOPE * logit)    # leaky_relu
        # TODO(synk): ragged per-destination segment softmax stays in XLA glue.
        alpha = segment_softmax(logit, dst_idx, Nd)                # [E, H]
        # TODO(synk): dropout(p=0.6) on alpha is stochastic; eval-mode identity used.

        # transposed messages / scatter so kernel B needs no in-kernel transposes:
        #   msgT[c, e]   = alpha[e, c//D] * x_proj_src[src[e], c]
        #   scatT[e, nd] = 1 iff dst[e] == nd   (duplicate edges accumulate via matmul)
        msgT = (jnp.repeat(alpha, D, axis=1) * x_proj[s][src_idx]).T     # [C, E]
        scatT = jnp.zeros((E, Nd), jnp.float32).at[
            jnp.arange(E), dst_idx].set(1.0)                             # [E, Nd]
        # TODO(synk): dense [E, Nd] scatter is fine at toy scale; large graphs should
        # switch to a sorted-edge PrefetchScalarGridSpec ragged-segment matmul.
        mt_pt_inputs.extend([msgT, scatT])
        et_dst_types.append(d)

    # --------------- classifier gather one-hots (edge_label_index) -------
    # E_pad = next multiple of 128 -> the single stored output row of kernel B is
    # lane-dense (unmasked vst); the zero-padded columns produce zero predictions
    # and are sliced off afterwards.
    e_src, e_dst = edge_label_index[0], edge_label_index[1]
    E_lab = e_src.shape[0]
    E_pad = ((E_lab + LANE - 1) // LANE) * LANE
    gsT = jnp.zeros((x_dict[cls_src].shape[0], E_pad), jnp.float32
                    ).at[e_src, jnp.arange(E_lab)].set(1.0)
    gdT = jnp.zeros((x_dict[cls_dst].shape[0], E_pad), jnp.float32
                    ).at[e_dst, jnp.arange(E_lab)].set(1.0)

    # ------ Kernel B: fused aggregation + semantic + classifier (one launch)
    needs_semantic = (et_dst_types.count(cls_src) > 1 or
                      et_dst_types.count(cls_dst) > 1)
    extra = []
    if needs_semantic:
        extra = [params['k_lin']['w'].T,
                 params['k_lin']['b'].reshape(C, 1),
                 params['q'].reshape(C, 1)]

    pred_row = pl.pallas_call(
        _make_fused_agg_classifier_kernel(tuple(et_dst_types), tuple(node_types),
                                          cls_src, cls_dst, needs_semantic),
        out_shape=jax.ShapeDtypeStruct((1, E_pad), jnp.float32),
    )(*mt_pt_inputs, *extra, gsT, gdT)
    return pred_row[0, :E_lab]


# --------------------------------------------------------------------------
# Deterministic parameter init (shapes follow HANConv.__init__)
# --------------------------------------------------------------------------
def init_params(key, in_channels, C, H, metadata):
    node_types, edge_types = metadata
    D = C // H
    params = {'proj': {}, 'att_src': {}, 'att_dst': {}}
    keys = iter(jax.random.split(key, 4 * len(node_types) + 2 * len(edge_types) + 3))

    for nt in node_types:
        params['proj'][nt] = {
            'w': 0.1 * jax.random.normal(next(keys), (in_channels[nt], C), jnp.float32),
            'b': 0.01 * jax.random.normal(next(keys), (C,), jnp.float32),
        }
    for et in edge_types:
        key_name = '__'.join(et)
        params['att_src'][key_name] = 0.1 * jax.random.normal(next(keys), (H, D), jnp.float32)
        params['att_dst'][key_name] = 0.1 * jax.random.normal(next(keys), (H, D), jnp.float32)
    params['k_lin'] = {
        'w': 0.1 * jax.random.normal(next(keys), (C, C), jnp.float32),
        'b': 0.01 * jax.random.normal(next(keys), (C,), jnp.float32),
    }
    params['q'] = 0.1 * jax.random.normal(next(keys), (1, C), jnp.float32)
    return params


# --------------------------------------------------------------------------
if __name__ == "__main__":
    key = jax.random.PRNGKey(0)
    metadata = (['paper', 'copaper'],
                [('paper', 'cites', 'copaper'), ('copaper', 'rev_cites', 'paper')])
    in_channels = {'paper': 16, 'copaper': 16}
    N_paper, N_copaper = 24, 20
    E, E_label = 64, 16

    k_xp, k_xc, k_s, k_d, k_l0, k_l1, k_par = jax.random.split(key, 7)
    x_dict = {
        'paper': jax.random.normal(k_xp, (N_paper, in_channels['paper']), jnp.float32),
        'copaper': jax.random.normal(k_xc, (N_copaper, in_channels['copaper']), jnp.float32),
    }
    src = jax.random.randint(k_s, (E,), 0, N_paper)
    dst = jax.random.randint(k_d, (E,), 0, N_copaper)
    edge_index_dict = {
        ('paper', 'cites', 'copaper'): jnp.stack([src, dst]).astype(jnp.int32),
        ('copaper', 'rev_cites', 'paper'): jnp.stack([dst, src]).astype(jnp.int32),
    }
    edge_label_index = jnp.stack([
        jax.random.randint(k_l0, (E_label,), 0, N_paper),
        jax.random.randint(k_l1, (E_label,), 0, N_copaper),
    ]).astype(jnp.int32)

    params = init_params(k_par, in_channels, HIDDEN, HEADS, metadata)

    fwd = jax.jit(functools.partial(han_link_prediction_forward, metadata=metadata))
    pred = fwd(params, x_dict, edge_index_dict, edge_label_index)
    pred = jax.block_until_ready(pred)
    assert pred.shape == (E_label,) and pred.dtype == jnp.float32
    print("KERNEL_OK")
</pallas_src>

<mosaic_0001>
module attributes {stable_mosaic.version = 11 : i64} {
  func.func @kernel(%arg0: memref<24x16xf32, #tpu.memory_space<vmem>>, %arg1: memref<16x32xf32, #tpu.memory_space<vmem>>, %arg2: memref<1x32xf32, #tpu.memory_space<vmem>>, %arg3: memref<32x16xf32, #tpu.memory_space<vmem>>, %arg4: memref<20x16xf32, #tpu.memory_space<vmem>>, %arg5: memref<16x32xf32, #tpu.memory_space<vmem>>, %arg6: memref<1x32xf32, #tpu.memory_space<vmem>>, %arg7: memref<32x16xf32, #tpu.memory_space<vmem>>, %arg8: memref<24x32xf32, #tpu.memory_space<vmem>>, %arg9: memref<24x16xf32, #tpu.memory_space<vmem>>, %arg10: memref<20x32xf32, #tpu.memory_space<vmem>>, %arg11: memref<20x16xf32, #tpu.memory_space<vmem>>) attributes {dimension_semantics = [], scalar_prefetch = 0 : i64, scratch_operands = 0 : i64, tpu.core_type = #tpu.core_type<tc>} {
    %c0 = arith.constant 0 : index
    %c0_0 = arith.constant 0 : index
    %0 = vector.load %arg0[%c0, %c0_0] : memref<24x16xf32, #tpu.memory_space<vmem>>, vector<24x16xf32>
    %c0_1 = arith.constant 0 : index
    %c0_2 = arith.constant 0 : index
    %1 = vector.load %arg1[%c0_1, %c0_2] : memref<16x32xf32, #tpu.memory_space<vmem>>, vector<16x32xf32>
    %cst = arith.constant dense<0.000000e+00> : vector<24x32xf32>
    %2 = tpu.matmul %0, %1, %cst {dimension_numbers = #tpu.dot_dimension_numbers<[1], [0], [0], [1], [0, 0, 1, 1], [], []>} : vector<24x16xf32>, vector<16x32xf32>, vector<24x32xf32> -> vector<24x32xf32>
    %c0_3 = arith.constant 0 : index
    %c0_4 = arith.constant 0 : index
    %3 = vector.load %arg2[%c0_3, %c0_4] : memref<1x32xf32, #tpu.memory_space<vmem>>, vector<1x32xf32>
    %4 = vector.broadcast %3 : vector<1x32xf32> to vector<24x32xf32>
    %5 = arith.addf %2, %4 : vector<24x32xf32>
    %c0_5 = arith.constant 0 : index
    %c0_6 = arith.constant 0 : index
    %6 = vector.load %arg8[%c0_5, %c0_6] : memref<24x32xf32, #tpu.memory_space<vmem>>, vector<24x32xf32>
    tpu.vector_store %arg8[%c0_5, %c0_6], %5 {strides = array<i32>} : memref<24x32xf32, #tpu.memory_space<vmem>>, vector<24x32xf32>,
    %c0_7 = arith.constant 0 : index
    %c0_8 = arith.constant 0 : index
    %7 = vector.load %arg3[%c0_7, %c0_8] : memref<32x16xf32, #tpu.memory_space<vmem>>, vector<32x16xf32>
    %cst_9 = arith.constant dense<0.000000e+00> : vector<24x16xf32>
    %8 = tpu.matmul %5, %7, %cst_9 {dimension_numbers = #tpu.dot_dimension_numbers<[1], [0], [0], [1], [0, 0, 1, 1], [], []>} : vector<24x32xf32>, vector<32x16xf32>, vector<24x16xf32> -> vector<24x16xf32>
    %c0_10 = arith.constant 0 : index
    %c0_11 = arith.constant 0 : index
    %9 = vector.load %arg9[%c0_10, %c0_11] : memref<24x16xf32, #tpu.memory_space<vmem>>, vector<24x16xf32>
    tpu.vector_store %arg9[%c0_10, %c0_11], %8 {strides = array<i32>} : memref<24x16xf32, #tpu.memory_space<vmem>>, vector<24x16xf32>,
    %c0_12 = arith.constant 0 : index
    %c0_13 = arith.constant 0 : index
    %10 = vector.load %arg4[%c0_12, %c0_13] : memref<20x16xf32, #tpu.memory_space<vmem>>, vector<20x16xf32>
    %c0_14 = arith.constant 0 : index
    %c0_15 = arith.constant 0 : index
    %11 = vector.load %arg5[%c0_14, %c0_15] : memref<16x32xf32, #tpu.memory_space<vmem>>, vector<16x32xf32>
    %cst_16 = arith.constant dense<0.000000e+00> : vector<20x32xf32>
    %12 = tpu.matmul %10, %11, %cst_16 {dimension_numbers = #tpu.dot_dimension_numbers<[1], [0], [0], [1], [0, 0, 1, 1], [], []>} : vector<20x16xf32>, vector<16x32xf32>, vector<20x32xf32> -> vector<20x32xf32>
    %c0_17 = arith.constant 0 : index
    %c0_18 = arith.constant 0 : index
    %13 = vector.load %arg6[%c0_17, %c0_18] : memref<1x32xf32, #tpu.memory_space<vmem>>, vector<1x32xf32>
    %14 = vector.broadcast %13 : vector<1x32xf32> to vector<20x32xf32>
    %15 = arith.addf %12, %14 : vector<20x32xf32>
    %c0_19 = arith.constant 0 : index
    %c0_20 = arith.constant 0 : index
    %16 = vector.load %arg10[%c0_19, %c0_20] : memref<20x32xf32, #tpu.memory_space<vmem>>, vector<20x32xf32>
    tpu.vector_store %arg10[%c0_19, %c0_20], %15 {strides = array<i32>} : memref<20x32xf32, #tpu.memory_space<vmem>>, vector<20x32xf32>,
    %c0_21 = arith.constant 0 : index
    %c0_22 = arith.constant 0 : index
    %17 = vector.load %arg7[%c0_21, %c0_22] : memref<32x16xf32, #tpu.memory_space<vmem>>, vector<32x16xf32>
    %cst_23 = arith.constant dense<0.000000e+00> : vector<20x16xf32>
    %18 = tpu.matmul %15, %17, %cst_23 {dimension_numbers = #tpu.dot_dimension_numbers<[1], [0], [0], [1], [0, 0, 1, 1], [], []>} : vector<20x32xf32>, vector<32x16xf32>, vector<20x16xf32> -> vector<20x16xf32>
    %c0_24 = arith.constant 0 : index
    %c0_25 = arith.constant 0 : index
    %19 = vector.load %arg11[%c0_24, %c0_25] : memref<20x16xf32, #tpu.memory_space<vmem>>, vector<20x16xf32>
    tpu.vector_store %arg11[%c0_24, %c0_25], %18 {strides = array<i32>} : memref<20x16xf32, #tpu.memory_space<vmem>>, vector<20x16xf32>,
    return
  }
}

module attributes {stable_mosaic.version = 11 : i64} {
  func.func @kernel(%arg0: memref<32x64xf32, #tpu.memory_space<vmem>>, %arg1: memref<64x20xf32, #tpu.memory_space<vmem>>, %arg2: memref<32x64xf32, #tpu.memory_space<vmem>>, %arg3: memref<64x24xf32, #tpu.memory_space<vmem>>, %arg4: memref<24x128xf32, #tpu.memory_space<vmem>>, %arg5: memref<20x128xf32, #tpu.memory_space<vmem>>, %arg6: memref<1x128xf32, #tpu.memory_space<vmem>>) attributes {dimension_semantics = [], scalar_prefetch = 0 : i64, scratch_operands = 0 : i64, tpu.core_type = #tpu.core_type<tc>} {
    %c0 = arith.constant 0 : index
    %c0_0 = arith.constant 0 : index
    %0 = vector.load %arg0[%c0, %c0_0] : memref<32x64xf32, #tpu.memory_space<vmem>>, vector<32x64xf32>
    %c0_1 = arith.constant 0 : index
    %c0_2 = arith.constant 0 : index
    %1 = vector.load %arg1[%c0_1, %c0_2] : memref<64x20xf32, #tpu.memory_space<vmem>>, vector<64x20xf32>
    %cst = arith.constant dense<0.000000e+00> : vector<32x20xf32>
    %2 = tpu.matmul %0, %1, %cst {dimension_numbers = #tpu.dot_dimension_numbers<[1], [0], [0], [1], [0, 0, 1, 1], [], []>} : vector<32x64xf32>, vector<64x20xf32>, vector<32x20xf32> -> vector<32x20xf32>
    %cst_3 = arith.constant 0.000000e+00 : f32
    %3 = vector.broadcast %cst_3 : f32 to vector<32x20xf32>
    %4 = arith.maximumf %2, %3 : vector<32x20xf32>
    %c0_4 = arith.constant 0 : index
    %c0_5 = arith.constant 0 : index
    %5 = vector.load %arg2[%c0_4, %c0_5] : memref<32x64xf32, #tpu.memory_space<vmem>>, vector<32x64xf32>
    %c0_6 = arith.constant 0 : index
    %c0_7 = arith.constant 0 : index
    %6 = vector.load %arg3[%c0_6, %c0_7] : memref<64x24xf32, #tpu.memory_space<vmem>>, vector<64x24xf32>
    %cst_8 = arith.constant dense<0.000000e+00> : vector<32x24xf32>
    %7 = tpu.matmul %5, %6, %cst_8 {dimension_numbers = #tpu.dot_dimension_numbers<[1], [0], [0], [1], [0, 0, 1, 1], [], []>} : vector<32x64xf32>, vector<64x24xf32>, vector<32x24xf32> -> vector<32x24xf32>
    %cst_9 = arith.constant 0.000000e+00 : f32
    %8 = vector.broadcast %cst_9 : f32 to vector<32x24xf32>
    %9 = arith.maximumf %7, %8 : vector<32x24xf32>
    %c0_10 = arith.constant 0 : index
    %c0_11 = arith.constant 0 : index
    %10 = vector.load %arg4[%c0_10, %c0_11] : memref<24x128xf32, #tpu.memory_space<vmem>>, vector<24x128xf32>
    %cst_12 = arith.constant dense<0.000000e+00> : vector<32x128xf32>
    %11 = tpu.matmul %9, %10, %cst_12 {dimension_numbers = #tpu.dot_dimension_numbers<[1], [0], [0], [1], [0, 0, 1, 1], [], []>} : vector<32x24xf32>, vector<24x128xf32>, vector<32x128xf32> -> vector<32x128xf32>
    %c0_13 = arith.constant 0 : index
    %c0_14 = arith.constant 0 : index
    %12 = vector.load %arg5[%c0_13, %c0_14] : memref<20x128xf32, #tpu.memory_space<vmem>>, vector<20x128xf32>
    %cst_15 = arith.constant dense<0.000000e+00> : vector<32x128xf32>
    %13 = tpu.matmul %4, %12, %cst_15 {dimension_numbers = #tpu.dot_dimension_numbers<[1], [0], [0], [1], [0, 0, 1, 1], [], []>} : vector<32x20xf32>, vector<20x128xf32>, vector<32x128xf32> -> vector<32x128xf32>
    %14 = arith.mulf %11, %13 : vector<32x128xf32>
    %cst_16 = arith.constant dense<0.000000e+00> : vector<128xf32>
    %15 = vector.multi_reduction <add>, %14, %cst_16 [0] : vector<32x128xf32> to vector<128xf32>
    %16 = vector.shape_cast %15 : vector<128xf32> to vector<1x128xf32>
    %c0_17 = arith.constant 0 : index
    %c0_18 = arith.constant 0 : index
    %17 = vector.load %arg6[%c0_17, %c0_18] : memref<1x128xf32, #tpu.memory_space<vmem>>, vector<1x128xf32>
    tpu.vector_store %arg6[%c0_17, %c0_18], %16 {strides = array<i32>} : memref<1x128xf32, #tpu.memory_space<vmem>>, vector<1x128xf32>,
    return
  }
}

</mosaic_0001>

<bundles_post_ra>
// kernel: mul.21
= control target key start
LH: loop header
LB: loop body
LE: loop exit
PB: predicated region body
PF: predicated region fallthrough
CT: control target
= control target key end

     0   :  { %s67_s10 = smov 28   ;;  %s68_s11 = smov 20   ;;  %vm3_vm0 = vcmask 31744   ;;  %vm9_vm1 = vcmask 261344   ;;  %vm15_vm2 = vcmask 228544   ;;  %vm21_vm3 = vcmask 195744   ;;  %s111_s0 = inlined_call_operand.vmem [shape: f32[8,4], index: 0, kind: input, shape index: {}]   ;;  %s112_s1 = inlined_call_operand.vmem [shape: f32[32], index: 1, kind: output, shape index: {}]  }
   0x1   :  { %v53_v0 = vld [vmem:[%s111_s0 + $0x7] sm:$0x1]   ;;  %v55_v1 = vld [vmem:[%s111_s0 + $0x5] sm:$0x1]   ;;  %v54_v2 = vld [vmem:[%s111_s0 + $0x6] sm:$0x1]  }
   0x2   :  { %7 = vrot.lane.b32.xlu0 %v53_v0, %s67_s10  ;;  %19 = vrot.lane.b32.xlu1 %v55_v1, %s68_s11  ;;  %v56_v3 = vld [vmem:[%s111_s0 + $0x4] sm:$0x1]   ;;  %v2_v4 = vld [vmem:[%s111_s0] sm:$0x1]   ;;  %s69_s18 = smov 24   ;;  %s70_s19 = smov 16  }
   0x3   :  { %4 = vst.msk [vmem:[#allocation0] sm:$0x1] %vm3_vm0, %v2_v4   ;;  %v57_v5 = vld [vmem:[%s111_s0 + $0x3] sm:$0x1]   ;;  %v58_v6 = vld [vmem:[%s111_s0 + $0x2] sm:$0x1]  }
   0x4   :  { %s71_s24 = smov 12   ;;  %s72_s25 = smov 8   ;;  %v59_v7 = vld [vmem:[%s111_s0 + $0x1] sm:$0x1]   ;;  %vm27_vm4 = vcmask 162944   ;;  %vm33_vm5 = vcmask 130144  }
   0x5   :  { %s73_s0 = smov 4   ;;  %vm39_vm6 = vcmask 97344   ;;  %vm45_vm7 = vcmask 64544  }
   0x6   :  { %13 = vrot.lane.b32.xlu0 %v54_v2, %s69_s18  ;;  %25 = vrot.lane.b32.xlu1 %v56_v3, %s70_s19 }
   0xa   :  { %31 = vrot.lane.b32.xlu0 %v57_v5, %s71_s24  ;;  %37 = vrot.lane.b32.xlu1 %v58_v6, %s72_s25 }
   0xe   :  { %43 = vrot.lane.b32.xlu0 %v59_v7, %s73_s0 }
  0x74   :  { %v8_v8 = vpop.permute.xlu0 %7   ;;  %v20_v9 = vpop.permute.xlu1 %19  }
  0x75   :  { %10 = vst.msk [vmem:[#allocation0] sm:$0x1] %vm9_vm1, %v8_v8  }
  0x78   :  { %v14_v10 = vpop.permute.xlu0 %13   ;;  %v26_v11 = vpop.permute.xlu1 %25  }
  0x79   :  { %16 = vst.msk [vmem:[#allocation0] sm:$0x1] %vm15_vm2, %v14_v10  }
  0x7a   :  { %22 = vst.msk [vmem:[#allocation0] sm:$0x1] %vm21_vm3, %v20_v9  }
  0x7b   :  { %28 = vst.msk [vmem:[#allocation0] sm:$0x1] %vm27_vm4, %v26_v11  }
  0x7c   :  { %v32_v12 = vpop.permute.xlu0 %31   ;;  %v38_v13 = vpop.permute.xlu1 %37  }
  0x7d   :  { %34 = vst.msk [vmem:[#allocation0] sm:$0x1] %vm33_vm5, %v32_v12  }
  0x7e   :  { %40 = vst.msk [vmem:[#allocation0] sm:$0x1] %vm39_vm6, %v38_v13  }
  0x80   :  { %v44_v14 = vpop.permute.xlu0 %43  }
  0x81   :  { %46 = vst.msk [vmem:[#allocation0] sm:$0x1] %vm45_vm7, %v44_v14  }
  0x88   :  { %v50_v15 = vld [vmem:[#allocation0] sm:$0x1] }
  0x89   :  { %52 = vst [vmem:[%s112_s1] sm:$0x1] %v50_v15 }

// kernel: han_link_prediction_forward.2
= control target key start
LH: loop header
LB: loop body
LE: loop exit
PB: predicated region body
PF: predicated region fallthrough
CT: control target
= control target key end

     0   :  { %v572_v0 = vmov 0.0|0.0   ;;  %vm573_vm0 = vmmov 0   ;;  %v574_v3 = vmov 0.0   ;;  %vm45_vm1 = vcmask 130048   ;;  %s783_s1 = inlined_call_operand.vmem [shape: f32[16,32], index: 1, kind: input, shape index: {}]   ;;  %s784_s5 = inlined_call_operand.vmem [shape: f32[16,32], index: 5, kind: input, shape index: {}]   ;;  %s785_s0 = inlined_call_operand.vmem [shape: f32[24,16], index: 0, kind: input, shape index: {}]   ;;  %s786_s3 = inlined_call_operand.vmem [shape: f32[32,16], index: 3, kind: input, shape index: {}]   ;;  %s787_s4 = inlined_call_operand.vmem [shape: f32[20,16], index: 4, kind: input, shape index: {}]   ;;  %s788_s7 = inlined_call_operand.vmem [shape: f32[32,16], index: 7, kind: input, shape index: {}]   ;;  %s789_s2 = inlined_call_operand.vmem [shape: f32[1,32], index: 2, kind: input, shape index: {}]   ;;  %s790_s8 = inlined_call_operand.vmem [shape: f32[24,32], index: 8, kind: output, shape index: {0}]   ;;  %s791_s6 = inlined_call_operand.vmem [shape: f32[1,32], index: 6, kind: input, shape index: {}]   ;;  %s792_s10 = inlined_call_operand.vmem [shape: f32[20,32], index: 10, kind: output, shape index: {2}]   ;;  %s793_s9 = inlined_call_operand.vmem [shape: f32[24,16], index: 9, kind: output, shape index: {1}]   ;;  %s794_s11 = inlined_call_operand.vmem [shape: f32[20,16], index: 11, kind: output, shape index: {3}]  }
   0x1   :  { %551 = vmatprep.subr.bf16.mxu0 %v572_v0  ;;  %v36_v1 = vld [vmem:[%s783_s1] sm:$0xff]  ;;  %v37_v2 = vld [vmem:[%s783_s1 + $0x8] sm:$0xff]  ;;  %495 = vmatprep.mubr.msk.f32.mxu0 %vm573_vm0, %v574_v3  ;;  %v35_v13 = vld [vmem:[%s785_s0 + $0x10] sm:$0xff]  ;;  %vm135_vm2 = vcmask 261120   ;;  %vm338_vm3 = vcmask 257024   ;;  %vm435_vm4 = vcmask 125952  }
   0x2   :  { %v552_v4 = vpack.c.bf16 %v37_v2, %v36_v1  ;;  %v238_v5 = vld [vmem:[%s784_s5] sm:$0xff]  ;;  %v239_v6 = vld [vmem:[%s784_s5 + $0x8] sm:$0xff]  ;;  %554 = vmatprep.subr.bf16.mxu1 %v572_v0  ;;  %512 = vmatprep.mubr.msk.f32.mxu1 %vm573_vm0, %v574_v3  ;;  %v237_v16 = vld [vmem:[%s787_s4 + $0x10] sm:$0xf] }
   0x3   :  { %v33_v7 = vld [vmem:[%s785_s0] sm:$0xff]  ;;  %v561_v8 = vpack.c.bf16 %v239_v6, %v238_v5  ;;  %v140_v10 = vld [vmem:[%s786_s3 + $0x8] sm:$0xff]  ;;  %v141_v17 = vld [vmem:[%s786_s3 + $0x10] sm:$0xff] }
   0x4   :  { %553 = vmatpush3.bf16.msra.mxu0 %v552_v4  ;;  %v139_v9 = vld [vmem:[%s786_s3] sm:$0xff]  ;;  %v34_v12 = vld [vmem:[%s785_s0 + $0x8] sm:$0xff]  ;;  %v142_v18 = vld [vmem:[%s786_s3 + $0x18] sm:$0xff] }
   0x5   :  { %560 = vmatprep.subr.bf16.mxu0 %v572_v0  ;;  %v555_v11 = vpack.c.bf16 %v140_v10, %v139_v9  ;;  %v235_v14 = vld [vmem:[%s787_s4] sm:$0xff]  ;;  %v236_v15 = vld [vmem:[%s787_s4 + $0x8] sm:$0xff]  ;;  %v558_v19 = vpack.c.bf16 %v142_v18, %v141_v17  ;;  %v342_v27 = vld [vmem:[%s788_s7 + $0x10] sm:$0xff] }
   0x6   :  { %v340_v20 = vld [vmem:[%s788_s7] sm:$0xff]  ;;  %v341_v21 = vld [vmem:[%s788_s7 + $0x8] sm:$0xff]  ;;  %v343_v28 = vld [vmem:[%s788_s7 + $0x18] sm:$0xff] }
   0x7   :  { %496 = vmatmul.mubr.msk.f32.vlgmr.msra.gmra.mrb[0].mxu0 %vm45_vm1, %v33_v7  ;;  %556 = vmatpush3.bf16.msra.mxu1 %v555_v11  ;;  %v453_v22 = vld [vmem:[%s789_s2] ss:$0 sm:$0xff]  ;;  %v564_v24 = vpack.c.bf16 %v341_v21, %v340_v20  ;;  %v567_v30 = vpack.c.bf16 %v343_v28, %v342_v27 }
   0x8   :  { %562 = vmatpush3.bf16.msra.mxu0 %v561_v8  ;;  %498 = vmatprep.mubr.msk.f32.mxu0 %vm573_vm0, %v574_v3  ;;  %v460_v36 = vld [vmem:[%s791_s6] ss:$0 sm:$0xff] }
   0x9   :  { %557 = vmatprep.subr.bf16.mxu1 %v572_v0 }
   0xb   :  { %499 = vmatmul.mubr.msk.f32.gmra.mrb[2].mxu0 %vm45_vm1, %v34_v12  ;;  %559 = vmatpush3.bf16.msra.mxu1 %v558_v19 }
   0xc   :  { %501 = vmatprep.mubr.msk.f32.mxu0 %vm573_vm0, %v574_v3  ;;  %563 = vmatprep.subr.bf16.mxu1 %v572_v0 }
   0xf   :  { %502 = vmatmul.mubr.msk.f32.gmra.mrb[4].mxu0 %vm45_vm1, %v35_v13 }
  0x10   :  { %525 = vmatprep.mubr.msk.f32.mxu0 %vm573_vm0, %v574_v3 }
  0x13   :  { %526 = vmatmul.mubr.msk.f32.vlgmr.msra.gmra.mrb[6].mxu0 %vm45_vm1, %v235_v14 }
  0x14   :  { %528 = vmatprep.mubr.msk.f32.mxu0 %vm573_vm0, %v574_v3 }
  0x17   :  { %529 = vmatmul.mubr.msk.f32.gmra.mrb[8].mxu0 %vm45_vm1, %v236_v15 }
  0x18   :  { %531 = vmatprep.mubr.msk.f32.mxu0 %vm573_vm0, %v574_v3 }
  0x1b   :  { %532 = vmatmul.mubr.msk.f32.gmra.mrb[10].mxu0 %vm45_vm1, %v237_v16 }
  0xda   :  { %v121_v23 = vpop.f32.mrb[0].mxu0 }
  0xdb   :  { %v122_v25 = vadd.f32 %v453_v22, %v121_v23  ;;  %v497_v26 = vpop.f32.mrb[1].mxu0 }
  0xdd   :  { %136 = vst.msk [vmem:[%s790_s8] sm:$0xff] %vm135_vm2, %v122_v25  ;;  %513 = vmatmul.mubr.msk.f32.vlgmr.msra.gmra.mrb[0].mxu1 %vm135_vm2, %v122_v25 }
  0xde   :  { %v126_v29 = vpop.f32.mrb[2].mxu0  ;;  %565 = vmatpush3.bf16.msra.mxu1 %v564_v24  ;;  %515 = vmatprep.mubr.msk.f32.mxu1 %vm573_vm0, %v574_v3 }
  0xdf   :  { %v127_v31 = vadd.f32 %v453_v22, %v126_v29  ;;  %v500_v32 = vpop.f32.mrb[3].mxu0  ;;  %566 = vmatprep.subr.bf16.mxu1 %v572_v0 }
  0xe1   :  { %137 = vst.msk [vmem:[%s790_s8 + $0x8] sm:$0xff] %vm135_vm2, %v127_v31  ;;  %516 = vmatmul.mubr.msk.f32.gmra.mrb[2].mxu1 %vm135_vm2, %v127_v31 }
  0xe2   :  { %v131_v33 = vpop.f32.mrb[4].mxu0  ;;  %518 = vmatprep.mubr.msk.f32.mxu1 %vm573_vm0, %v574_v3  ;;  %568 = vmatpush3.bf16.msra.mxu1 %v567_v30 }
  0xe3   :  { %v132_v34 = vadd.f32 %v453_v22, %v131_v33  ;;  %v503_v35 = vpop.f32.mrb[5].mxu0 }
  0xe5   :  { %138 = vst.msk [vmem:[%s790_s8 + $0x10] sm:$0xff] %vm135_vm2, %v132_v34  ;;  %519 = vmatmul.mubr.msk.f32.gmra.mrb[4].mxu1 %vm135_vm2, %v132_v34 }
  0xe6   :  { %v322_v37 = vpop.f32.mrb[6].mxu0  ;;  %542 = vmatprep.mubr.msk.f32.mxu1 %vm573_vm0, %v574_v3 }
  0xe7   :  { %v323_v38 = vadd.f32 %v460_v36, %v322_v37  ;;  %v527_v39 = vpop.f32.mrb[7].mxu0 }
  0xe9   :  { %336 = vst.msk [vmem:[%s792_s10] sm:$0xff] %vm135_vm2, %v323_v38  ;;  %543 = vmatmul.mubr.msk.f32.vlgmr.msra.gmra.mrb[6].mxu1 %vm135_vm2, %v323_v38 }
  0xea   :  { %v327_v40 = vpop.f32.mrb[8].mxu0  ;;  %545 = vmatprep.mubr.msk.f32.mxu1 %vm573_vm0, %v574_v3 }
  0xeb   :  { %v328_v41 = vadd.f32 %v460_v36, %v327_v40  ;;  %v530_v42 = vpop.f32.mrb[9].mxu0 }
  0xed   :  { %337 = vst.msk [vmem:[%s792_s10 + $0x8] sm:$0xff] %vm135_vm2, %v328_v41  ;;  %546 = vmatmul.mubr.msk.f32.gmra.mrb[8].mxu1 %vm135_vm2, %v328_v41 }
  0xee   :  { %v332_v43 = vpop.f32.mrb[10].mxu0  ;;  %548 = vmatprep.mubr.msk.f32.mxu1 %vm573_vm0, %v574_v3 }
  0xef   :  { %v333_v44 = vadd.f32 %v460_v36, %v332_v43  ;;  %v533_v45 = vpop.f32.mrb[11].mxu0 }
  0xf1   :  { %339 = vst.msk [vmem:[%s792_s10 + $0x10] sm:$0xf] %vm338_vm3, %v333_v44  ;;  %549 = vmatmul.mubr.msk.f32.gmra.mrb[10].mxu1 %vm135_vm2, %v333_v44 }
 0x1b0   :  { %v218_v46 = vpop.f32.mrb[0].mxu1 }
 0x1b1   :  { %232 = vst.msk [vmem:[%s793_s9] sm:$0xff] %vm45_vm1, %v218_v46  ;;  %v514_v47 = vpop.f32.mrb[1].mxu1 }
 0x1b4   :  { %v223_v48 = vpop.f32.mrb[2].mxu1 }
 0x1b5   :  { %233 = vst.msk [vmem:[%s793_s9 + $0x8] sm:$0xff] %vm45_vm1, %v223_v48  ;;  %v517_v49 = vpop.f32.mrb[3].mxu1 }
 0x1b8   :  { %v228_v50 = vpop.f32.mrb[4].mxu1 }
 0x1b9   :  { %234 = vst.msk [vmem:[%s793_s9 + $0x10] sm:$0xff] %vm45_vm1, %v228_v50  ;;  %v520_v51 = vpop.f32.mrb[5].mxu1 }
 0x1bc   :  { %v419_v52 = vpop.f32.mrb[6].mxu1 }
 0x1bd   :  { %433 = vst.msk [vmem:[%s794_s11] sm:$0xff] %vm45_vm1, %v419_v52  ;;  %v544_v53 = vpop.f32.mrb[7].mxu1 }
 0x1c0   :  { %v424_v54 = vpop.f32.mrb[8].mxu1 }
 0x1c1   :  { %434 = vst.msk [vmem:[%s794_s11 + $0x8] sm:$0xff] %vm45_vm1, %v424_v54  ;;  %v547_v55 = vpop.f32.mrb[9].mxu1 }
 0x1c4   :  { %v429_v56 = vpop.f32.mrb[10].mxu1 }
 0x1c5   :  { %436 = vst.msk [vmem:[%s794_s11 + $0x10] sm:$0xf] %vm435_vm4, %v429_v56  ;;  %v550_v57 = vpop.f32.mrb[11].mxu1 }

// kernel: han_link_prediction_forward.3
= control target key start
LH: loop header
LB: loop body
LE: loop exit
PB: predicated region body
PF: predicated region fallthrough
CT: control target
= control target key end

     0   :  { %vm35_vm0 = vcmask 523264   ;;  %vm367_vm1 = vcmask 1043456   ;;  %vm354_vm2 = vcmask 162816   ;;  %vm253_vm3 = vcmask 195584   ;;  %s781_s1 = inlined_call_operand.vmem [shape: f32[64,20], index: 1, kind: input, shape index: {}]   ;;  %s782_s3 = inlined_call_operand.vmem [shape: f32[64,24], index: 3, kind: input, shape index: {}]   ;;  %s783_s0 = inlined_call_operand.vmem [shape: f32[32,64], index: 0, kind: input, shape index: {}]   ;;  %s784_s2 = inlined_call_operand.vmem [shape: f32[32,64], index: 2, kind: input, shape index: {}]   ;;  %s785_s4 = inlined_call_operand.vmem [shape: f32[24,128], index: 4, kind: input, shape index: {}]   ;;  %s786_s5 = inlined_call_operand.vmem [shape: f32[20,128], index: 5, kind: input, shape index: {}]   ;;  %s787_s6 = inlined_call_operand.vmem [shape: f32[1,128], index: 6, kind: output, shape index: {}]  }
   0x1   :  { %v27_v0 = vld [vmem:[%s781_s1] sm:$0xff]  ;;  %v28_v1 = vld [vmem:[%s781_s1 + $0x8] sm:$0xff]  ;;  %v29_v5 = vld [vmem:[%s781_s1 + $0x10] sm:$0xff] }
   0x2   :  { %v141_v2 = vld [vmem:[%s782_s3] sm:$0xff]  ;;  %v597_v3 = vpack.c.bf16 %v28_v1, %v27_v0  ;;  %v142_v4 = vld [vmem:[%s782_s3 + $0x8] sm:$0xff]  ;;  %v30_v6 = vld [vmem:[%s781_s1 + $0x18] sm:$0xff] }
   0x3   :  { %v613_v7 = vpack.c.bf16 %v142_v4, %v141_v2  ;;  %v601_v8 = vpack.c.bf16 %v30_v6, %v29_v5  ;;  %v143_v9 = vld [vmem:[%s782_s3 + $0x10] sm:$0xff]  ;;  %v144_v10 = vld [vmem:[%s782_s3 + $0x18] sm:$0xff]  ;;  %v31_v11 = vld [vmem:[%s781_s1 + $0x20] sm:$0xff] }
   0x4   :  { %598 = vmatprep.subr.bf16.mxu0 %v597_v3  ;;  %v617_v12 = vpack.c.bf16 %v144_v10, %v143_v9  ;;  %v32_v13 = vld [vmem:[%s781_s1 + $0x28] sm:$0xff]  ;;  %v145_v14 = vld [vmem:[%s782_s3 + $0x20] sm:$0xff]  ;;  %v33_v20 = vld [vmem:[%s781_s1 + $0x30] sm:$0xff] }
   0x5   :  { %v146_v15 = vld [vmem:[%s782_s3 + $0x28] sm:$0xff]  ;;  %614 = vmatprep.subr.bf16.mxu1 %v613_v7  ;;  %600 = vmatpush3.bf16.msra.mxu0 %v597_v3  ;;  %v605_v16 = vpack.c.bf16 %v32_v13, %v31_v11  ;;  %v23_v17 = vld [vmem:[%s783_s0] sm:$0xff]  ;;  %v34_v21 = vld [vmem:[%s781_s1 + $0x38] sm:$0xff] }
   0x6   :  { %616 = vmatpush3.bf16.msra.mxu1 %v613_v7  ;;  %602 = vmatprep.subr.bf16.mxu0 %v601_v8  ;;  %v137_v18 = vld [vmem:[%s784_s2] sm:$0xff]  ;;  %v621_v19 = vpack.c.bf16 %v146_v15, %v145_v14  ;;  %v147_v22 = vld [vmem:[%s782_s3 + $0x30] sm:$0xff]  ;;  %v148_v23 = vld [vmem:[%s782_s3 + $0x38] sm:$0xff]  ;;  %v609_v24 = vpack.c.bf16 %v34_v21, %v33_v20 }
   0x7   :  { %618 = vmatprep.subr.bf16.mxu1 %v617_v12  ;;  %545 = vmatprep.mubr.msk.f32.mxu0 %vm35_vm0, %v23_v17  ;;  %v625_v25 = vpack.c.bf16 %v148_v23, %v147_v22  ;;  %v250_v26 = vld [vmem:[%s785_s4] sm:$0xff]  ;;  %v251_v27 = vld [vmem:[%s785_s4 + $0x8] sm:$0xff]  ;;  %v25_v34 = vld [vmem:[%s783_s0 + $0x10] sm:$0xff] }
   0x8   :  { %567 = vmatprep.mubr.msk.f32.mxu1 %vm35_vm0, %v137_v18  ;;  %v351_v28 = vld [vmem:[%s786_s5] sm:$0xff]  ;;  %v352_v29 = vld [vmem:[%s786_s5 + $0x8] sm:$0xff]  ;;  %v629_v30 = vpack.c.bf16 %v251_v27, %v250_v26  ;;  %v139_v35 = vld [vmem:[%s784_s2 + $0x10] sm:$0xff] }
   0x9   :  { %604 = vmatpush3.bf16.msra.mxu0 %v601_v8  ;;  %v633_v31 = vpack.c.bf16 %v352_v29, %v351_v28  ;;  %v24_v32 = vld [vmem:[%s783_s0 + $0x8] sm:$0xff]  ;;  %v26_v36 = vld [vmem:[%s783_s0 + $0x18] sm:$0xff]  ;;  %v252_v38 = vld [vmem:[%s785_s4 + $0x10] sm:$0xff] }
   0xa   :  { %620 = vmatpush3.bf16.msra.mxu1 %v617_v12  ;;  %606 = vmatprep.subr.bf16.mxu0 %v605_v16  ;;  %v138_v33 = vld [vmem:[%s784_s2 + $0x8] sm:$0xff]  ;;  %v140_v37 = vld [vmem:[%s784_s2 + $0x18] sm:$0xff]  ;;  %v353_v39 = vld [vmem:[%s786_s5 + $0x10] sm:$0xf] }
   0xb   :  { %622 = vmatprep.subr.bf16.mxu1 %v621_v19 }
   0xd   :  { %608 = vmatpush3.bf16.msra.mxu0 %v605_v16 }
   0xe   :  { %624 = vmatpush3.bf16.msra.mxu1 %v621_v19  ;;  %610 = vmatprep.subr.bf16.mxu0 %v609_v24 }
   0xf   :  { %626 = vmatprep.subr.bf16.mxu1 %v625_v25 }
  0x11   :  { %612 = vmatpush3.bf16.msra.mxu0 %v609_v24 }
  0x12   :  { %628 = vmatpush3.bf16.msra.mxu1 %v625_v25  ;;  %630 = vmatprep.subr.bf16.mxu0 %v629_v30 }
  0x13   :  { %634 = vmatprep.subr.bf16.mxu1 %v633_v31 }
  0x14   :  { %546 = vmatmul.mubr.msk.f32.vlgmr.msra.gmra.mrb[0].mxu0 %vm35_vm0, %v24_v32 }
  0x15   :  { %568 = vmatmul.mubr.msk.f32.vlgmr.msra.gmra.mrb[0].mxu1 %vm35_vm0, %v138_v33  ;;  %548 = vmatprep.mubr.msk.f32.mxu0 %vm35_vm0, %v25_v34 }
  0x16   :  { %570 = vmatprep.mubr.msk.f32.mxu1 %vm35_vm0, %v139_v35  ;;  %632 = vmatpush3.bf16.msra.mxu0 %v629_v30 }
  0x17   :  { %636 = vmatpush3.bf16.msra.mxu1 %v633_v31  ;;  %577 = vmatprep.subr.mxu0 %v252_v38 }
  0x18   :  { %549 = vmatmul.mubr.msk.f32.gmra.mrb[2].mxu0 %vm35_vm0, %v26_v36  ;;  %589 = vmatprep.subr.msk.mxu1 %vm367_vm1, %v353_v39 }
  0x19   :  { %571 = vmatmul.mubr.msk.f32.gmra.mrb[2].mxu1 %vm35_vm0, %v140_v37 }
  0x1a   :  { %578 = vmatpush3.msra.mxu0 %v252_v38 }
  0x1b   :  { %590 = vmatpush3.msk.msra.mxu1 %vm367_vm1, %v353_v39 }
  0xe7   :  { %v547_v40 = vpop.f32.mrb[0].mxu0 }
  0xe8   :  { %v569_v41 = vpop.f32.mrb[0].mxu1  ;;  %v114_v42 = vpop.f32.mrb[1].mxu0  ;;  %v134_v45 = vmax.f32 %v547_v40, 0.0 }
  0xe9   :  { %v133_v43 = vmax.f32 %v114_v42, 0.0  ;;  %v227_v44 = vpop.f32.mrb[1].mxu1  ;;  %v247_v47 = vmax.f32 %v569_v41, 0.0 }
  0xea   :  { %v246_v46 = vmax.f32 %v227_v44, 0.0 }
  0xeb   :  { %v550_v48 = vpop.f32.mrb[2].mxu0  ;;  %591 = vmatprep.mubr.msk.f32.mxu1 %vm354_vm2, %v133_v43 }
  0xec   :  { %v572_v49 = vpop.f32.mrb[2].mxu1  ;;  %579 = vmatprep.mubr.msk.f32.mxu0 %vm253_vm3, %v246_v46  ;;  %v124_v50 = vpop.f32.mrb[3].mxu0  ;;  %592 = vmatmul.mubr.msk.f32.vlgmr.msra.gmra.mrb[4].mxu1 %vm354_vm2, %v134_v45  ;;  %v136_v53 = vmax.f32 %v550_v48, 0.0 }
  0xed   :  { %v135_v51 = vmax.f32 %v124_v50, 0.0  ;;  %v237_v52 = vpop.f32.mrb[3].mxu1  ;;  %580 = vmatmul.mubr.msk.f32.vlgmr.msra.gmra.mrb[4].mxu0 %vm253_vm3, %v247_v47  ;;  %v249_v55 = vmax.f32 %v572_v49, 0.0 }
  0xee   :  { %v248_v54 = vmax.f32 %v237_v52, 0.0 }
  0xef   :  { %594 = vmatprep.mubr.msk.f32.mxu1 %vm354_vm2, %v135_v51 }
  0xf0   :  { %582 = vmatprep.mubr.msk.f32.mxu0 %vm253_vm3, %v248_v54  ;;  %595 = vmatmul.mubr.msk.f32.gmra.mrb[6].mxu1 %vm354_vm2, %v136_v53 }
  0xf1   :  { %583 = vmatmul.mubr.msk.f32.gmra.mrb[6].mxu0 %vm253_vm3, %v249_v55 }
 0x1bf   :  { %v593_v56 = vpop.f32.mrb[4].mxu1 }
 0x1c0   :  { %v581_v57 = vpop.f32.mrb[4].mxu0  ;;  %v437_v58 = vpop.f32.mrb[5].mxu1 }
 0x1c1   :  { %v457_v59 = vmul.f32 %v593_v56, %v581_v57  ;;  %v332_v60 = vpop.f32.mrb[5].mxu0 }
 0x1c2   :  { %v456_v61 = vmul.f32 %v437_v58, %v332_v60 }
 0x1c3   :  { %v596_v62 = vpop.f32.mrb[6].mxu1 }
 0x1c4   :  { %v460_v63 = vadd.f32 %v457_v59, %v456_v61  ;;  %v584_v0 = vpop.f32.mrb[6].mxu0  ;;  %v447_v1 = vpop.f32.mrb[7].mxu1 }
 0x1c5   :  { %v459_v2 = vmul.f32 %v596_v62, %v584_v0  ;;  %v342_v3 = vpop.f32.mrb[7].mxu0 }
 0x1c6   :  { %v458_v4 = vmul.f32 %v447_v1, %v342_v3 }
 0x1c8   :  { %v461_v5 = vadd.f32 %v460_v63, %v458_v4 }
 0x1ca   :  { %v462_v6 = vadd.f32 %v461_v5, %v459_v2 }
 0x1cc   :  { %v463_v7 = vrot.slane %v462_v6, 4 }
 0x1ce   :  { %v464_v8 = vadd.f32 %v463_v7, %v462_v6 }
 0x1d0   :  { %v465_v9 = vrot.slane %v464_v8, 2 }
 0x1d2   :  { %v466_v10 = vadd.f32 %v465_v9, %v464_v8 }
 0x1d4   :  { %v467_v11 = vrot.slane %v466_v10, 1 }
 0x1d6   :  { %v468_v12 = vadd.f32 %v467_v11, %v466_v10 }
 0x1d8   :  { %469 = vst [vmem:[%s787_s6] sm:$0x1] %v468_v12 }

</bundles_post_ra>
